<compile_context>
chip_gen: v7x
topology: tpu7x:2x2x1
jax: 0.10.0
libtpu: 0.0.40
codegen_flags: <defaults>
</compile_context>

<pallas_src>
import jax
import jax.numpy as jnp
from jax.experimental import pallas as pl
from jax.experimental.pallas import tpu as pltpu


LANE = 128  # TPU vreg lane width


def _round_up(x, m):
    return (x + m - 1) // m * m


def policy_net_kernel(x_ref, w1_ref, b1_ref, w2_ref, b2_ref, w3_ref, b3_ref,
                      out_ref):
    # One batch tile per grid step: x is (TB, in_pad), output is (TB, A_pad).
    mxu_dtype = w1_ref.dtype          # weights pre-cast once in prepare_params
    x = x_ref[...].astype(mxu_dtype)

    # Layer 1: Linear + ReLU (MXU matmul, f32 accumulate, f32 elementwise).
    h1 = jnp.dot(x, w1_ref[...], preferred_element_type=jnp.float32)
    h1 = jnp.maximum(h1 + b1_ref[...], 0.0)                         # (TB, H)

    # Layer 2: Linear + ReLU.
    h2 = jnp.dot(h1.astype(mxu_dtype), w2_ref[...],
                 preferred_element_type=jnp.float32)
    h2 = jnp.maximum(h2 + b2_ref[...], 0.0)                         # (TB, H)

    # Output layer: Linear -> logits.  Padded action columns carry a -1e30
    # bias so they contribute exactly zero probability after softmax.
    logits = jnp.dot(h2.astype(mxu_dtype), w3_ref[...],
                     preferred_element_type=jnp.float32)
    logits = logits + b3_ref[...]                                   # (TB, A_pad)

    # Numerically-stable softmax.  Exact divide: Categorical needs rows that
    # sum to 1 (approx reciprocal left ~1e-3 normalization error).
    m = jnp.max(logits, axis=-1, keepdims=True)
    e = jnp.exp(logits - m)
    s = jnp.sum(e, axis=-1, keepdims=True)
    out_ref[...] = e / s                                            # lane-dense store


def init_linear(key, in_features, out_features):
    """PyTorch-default-style init: U(-1/sqrt(fan_in), +1/sqrt(fan_in)). Layout (out, in)."""
    kw, kb = jax.random.split(key)
    bound = 1.0 / jnp.sqrt(jnp.float32(in_features))
    w = jax.random.uniform(kw, (out_features, in_features), jnp.float32,
                           minval=-bound, maxval=bound)
    b = jax.random.uniform(kb, (out_features,), jnp.float32,
                           minval=-bound, maxval=bound)
    return w, b


def init_policy_net(key, in_size, act_size, hidden_size=128):
    k1, k2, k3 = jax.random.split(key, 3)
    return (
        init_linear(k1, in_size, hidden_size),
        init_linear(k2, hidden_size, hidden_size),
        init_linear(k3, hidden_size, act_size),
    )


def prepare_params(params, act_size, *, mxu_dtype=jnp.bfloat16):
    """One-time layout prep (call once, reuse every rollout step):
       - transpose weights to (in, out) and cast them to the MXU input dtype
         (bf16 by default: native MXU rate on v5e/v6e/v7x; accumulation stays f32),
       - pad the input-feature dim to 128 (zero rows of W1),
       - pad the action dim to 128; padded logits get a -1e30 bias so softmax
         assigns them exactly zero probability (safe in f32/bf16; do NOT cast
         b3 to fp16/fp8),
       - reshape biases to (1, out), kept in f32."""
    (w1, b1), (w2, b2), (w3, b3) = params
    in_size = w1.shape[1]
    hidden = w3.shape[1]
    in_pad = _round_up(in_size, LANE)
    a_pad = _round_up(act_size, LANE)

    w1t = (jnp.zeros((in_pad, hidden), jnp.float32)
           .at[:in_size, :].set(w1.T).astype(mxu_dtype))
    w2t = jnp.asarray(w2.T, jnp.float32).astype(mxu_dtype)
    w3t = (jnp.zeros((hidden, a_pad), jnp.float32)
           .at[:, :act_size].set(w3.T).astype(mxu_dtype))

    b1r = b1[None, :].astype(jnp.float32)
    b2r = b2[None, :].astype(jnp.float32)
    b3r = jnp.full((1, a_pad), -1e30, jnp.float32).at[0, :act_size].set(b3)

    return (w1t, b1r, w2t, b2r, w3t, b3r)


def policy_net_forward(state, kernel_params, act_size, *, batch_tile=512):
    """state: (B, in_size) f32. Returns Categorical probs (B, act_size) f32.

    The batch is tiled over a 'parallel' grid axis (TB rows per step, TB chosen
    so there are >= 2 grid steps whenever B allows -> both v7x TensorCores are
    used); weights/biases are VMEM-resident across all tiles.  The last batch
    block is masked (no wrapper-side batch padding)."""
    w1t, b1r, w2t, b2r, w3t, b3r = kernel_params
    B, in_size = state.shape
    in_pad, H = w1t.shape
    A_pad = w3t.shape[1]

    # Batch tile: multiple of 8 (f32 sublanes), capped at batch_tile, and kept
    # to >= 2 grid steps when possible so megacore parallelism applies.
    if B >= 16:
        TB = min(_round_up(batch_tile, 8), _round_up(pl.cdiv(B, 2), 8))
    else:
        TB = _round_up(max(B, 8), 8)

    # At most one small pad per call: feature columns up to the lane-dense
    # width (contents irrelevant: the extra W1 rows are zero), and rows only
    # for tiny batches (< one sublane group).
    B_out = max(B, 8)
    pad_rows = B_out - B
    pad_cols = in_pad - in_size
    if pad_rows or pad_cols:
        state = jnp.pad(state, ((0, pad_rows), (0, pad_cols)))

    probs_pad = pl.pallas_call(
        policy_net_kernel,
        out_shape=jax.ShapeDtypeStruct((B_out, A_pad), jnp.float32),
        grid=(pl.cdiv(B_out, TB),),
        in_specs=[
            pl.BlockSpec((TB, in_pad), lambda i: (i, 0)),     # state tile
            pl.BlockSpec((in_pad, H), lambda i: (0, 0)),      # W1 (resident, mxu dtype)
            pl.BlockSpec((1, H), lambda i: (0, 0)),           # b1 (f32)
            pl.BlockSpec((H, H), lambda i: (0, 0)),           # W2
            pl.BlockSpec((1, H), lambda i: (0, 0)),           # b2
            pl.BlockSpec((H, A_pad), lambda i: (0, 0)),       # W3 (act-padded)
            pl.BlockSpec((1, A_pad), lambda i: (0, 0)),       # b3 (act-padded)
        ],
        out_specs=pl.BlockSpec((TB, A_pad), lambda i: (i, 0)),   # lane-dense store
        compiler_params=pltpu.CompilerParams(
            dimension_semantics=("parallel",)),
    )(state, w1t, b1r, w2t, b2r, w3t, b3r)

    return probs_pad[:B, :act_size]


# TODO(synk): torch.distributions.Categorical sampling / log_prob is not fused
# into the kernel epilogue (pltpu.prng_seed + Gumbel-max would cut the padded
# prob writeback ~32x); the kernel returns the probability matrix that
# parameterizes the distribution.


def _reference_probs(state, params):
    """Pure-JAX f32 reference with HIGHEST-precision matmuls (PyTorch layout)."""
    (w1, b1), (w2, b2), (w3, b3) = params
    hp = jax.lax.Precision.HIGHEST
    h1 = jax.nn.relu(jnp.dot(state, w1.T, precision=hp) + b1)
    h2 = jax.nn.relu(jnp.dot(h1, w2.T, precision=hp) + b2)
    return jax.nn.softmax(jnp.dot(h2, w3.T, precision=hp) + b3, axis=-1)


if __name__ == "__main__":
    key = jax.random.PRNGKey(0)
    kp, kx = jax.random.split(key)

    # LunarLander-like: obs=8, act=4; hidden=128 (module default, lane-dense).
    # Batch of 256 rollout states per call to amortize per-call overhead.
    batch, in_size, act_size, hidden_size = 256, 8, 4, 128

    params = init_policy_net(kp, in_size, act_size, hidden_size)
    state = jax.random.normal(kx, (batch, in_size), jnp.float32)
    ref = _reference_probs(state, params)

    # Default path: bf16 MXU inputs, f32 accumulation / elementwise.
    kparams = prepare_params(params, act_size)                 # one-time layout prep
    probs = jax.block_until_ready(policy_net_forward(state, kparams, act_size))
    assert probs.shape == (batch, act_size)
    assert bool(jnp.all(jnp.abs(jnp.sum(probs, axis=-1) - 1.0) < 1e-4))
    assert bool(jnp.allclose(probs, ref, atol=2e-2))

    # f32 MXU path: tighter agreement with the f32 reference.
    kparams32 = prepare_params(params, act_size, mxu_dtype=jnp.float32)
    probs32 = jax.block_until_ready(policy_net_forward(state, kparams32, act_size))
    assert bool(jnp.all(jnp.abs(jnp.sum(probs32, axis=-1) - 1.0) < 1e-4))
    assert bool(jnp.allclose(probs32, ref, atol=2e-3))

    # Ragged-batch path (B not a multiple of the tile -> masked last block).
    ragged = jax.block_until_ready(policy_net_forward(state[:130], kparams32, act_size))
    assert ragged.shape == (130, act_size)
    assert bool(jnp.allclose(ragged, ref[:130], atol=2e-3))

    print("KERNEL_OK")
</pallas_src>

<mosaic_0001>
module attributes {stable_mosaic.version = 11 : i64} {
  func.func @policy_net_kernel(%arg0: i32, %arg1: memref<128x128xf32, #tpu.memory_space<vmem>>, %arg2: memref<128x128xbf16, #tpu.memory_space<vmem>>, %arg3: memref<1x128xf32, #tpu.memory_space<vmem>>, %arg4: memref<128x128xbf16, #tpu.memory_space<vmem>>, %arg5: memref<1x128xf32, #tpu.memory_space<vmem>>, %arg6: memref<128x128xbf16, #tpu.memory_space<vmem>>, %arg7: memref<1x128xf32, #tpu.memory_space<vmem>>, %arg8: memref<128x128xf32, #tpu.memory_space<vmem>>) attributes {dimension_semantics = [#tpu.dimension_semantics<parallel>], iteration_bounds = array<i64: 2>, scalar_prefetch = 0 : i64, scratch_operands = 0 : i64, tpu.core_type = #tpu.core_type<tc>, window_params = [{transform_indices = @transform_0, window_bounds = array<i64: 128, 128>}, {pipeline_mode = #tpu.pipeline_mode<synchronous>, transform_indices = @transform_1, window_bounds = array<i64: 128, 128>}, {pipeline_mode = #tpu.pipeline_mode<synchronous>, transform_indices = @transform_2, window_bounds = array<i64: 1, 128>}, {pipeline_mode = #tpu.pipeline_mode<synchronous>, transform_indices = @transform_3, window_bounds = array<i64: 128, 128>}, {pipeline_mode = #tpu.pipeline_mode<synchronous>, transform_indices = @transform_4, window_bounds = array<i64: 1, 128>}, {pipeline_mode = #tpu.pipeline_mode<synchronous>, transform_indices = @transform_5, window_bounds = array<i64: 128, 128>}, {pipeline_mode = #tpu.pipeline_mode<synchronous>, transform_indices = @transform_6, window_bounds = array<i64: 1, 128>}, {transform_indices = @transform_7, window_bounds = array<i64: 128, 128>}]} {
    %c0 = arith.constant 0 : index
    %c0_0 = arith.constant 0 : index
    %0 = vector.load %arg1[%c0, %c0_0] : memref<128x128xf32, #tpu.memory_space<vmem>>, vector<128x128xf32>
    %1 = arith.truncf %0 : vector<128x128xf32> to vector<128x128xbf16>
    %c0_1 = arith.constant 0 : index
    %c0_2 = arith.constant 0 : index
    %2 = vector.load %arg2[%c0_1, %c0_2] : memref<128x128xbf16, #tpu.memory_space<vmem>>, vector<128x128xbf16>
    %cst = arith.constant dense<0.000000e+00> : vector<128x128xf32>
    %3 = tpu.matmul %1, %2, %cst {dimension_numbers = #tpu.dot_dimension_numbers<[1], [0], [0], [1], [0, 0, 1, 1], [], []>} : vector<128x128xbf16>, vector<128x128xbf16>, vector<128x128xf32> -> vector<128x128xf32>
    %c0_3 = arith.constant 0 : index
    %c0_4 = arith.constant 0 : index
    %4 = vector.load %arg3[%c0_3, %c0_4] : memref<1x128xf32, #tpu.memory_space<vmem>>, vector<1x128xf32>
    %5 = vector.broadcast %4 : vector<1x128xf32> to vector<128x128xf32>
    %6 = arith.addf %3, %5 : vector<128x128xf32>
    %cst_5 = arith.constant 0.000000e+00 : f32
    %7 = vector.broadcast %cst_5 : f32 to vector<128x128xf32>
    %8 = arith.maximumf %6, %7 : vector<128x128xf32>
    %9 = arith.truncf %8 : vector<128x128xf32> to vector<128x128xbf16>
    %c0_6 = arith.constant 0 : index
    %c0_7 = arith.constant 0 : index
    %10 = vector.load %arg4[%c0_6, %c0_7] : memref<128x128xbf16, #tpu.memory_space<vmem>>, vector<128x128xbf16>
    %cst_8 = arith.constant dense<0.000000e+00> : vector<128x128xf32>
    %11 = tpu.matmul %9, %10, %cst_8 {dimension_numbers = #tpu.dot_dimension_numbers<[1], [0], [0], [1], [0, 0, 1, 1], [], []>} : vector<128x128xbf16>, vector<128x128xbf16>, vector<128x128xf32> -> vector<128x128xf32>
    %c0_9 = arith.constant 0 : index
    %c0_10 = arith.constant 0 : index
    %12 = vector.load %arg5[%c0_9, %c0_10] : memref<1x128xf32, #tpu.memory_space<vmem>>, vector<1x128xf32>
    %13 = vector.broadcast %12 : vector<1x128xf32> to vector<128x128xf32>
    %14 = arith.addf %11, %13 : vector<128x128xf32>
    %cst_11 = arith.constant 0.000000e+00 : f32
    %15 = vector.broadcast %cst_11 : f32 to vector<128x128xf32>
    %16 = arith.maximumf %14, %15 : vector<128x128xf32>
    %17 = arith.truncf %16 : vector<128x128xf32> to vector<128x128xbf16>
    %c0_12 = arith.constant 0 : index
    %c0_13 = arith.constant 0 : index
    %18 = vector.load %arg6[%c0_12, %c0_13] : memref<128x128xbf16, #tpu.memory_space<vmem>>, vector<128x128xbf16>
    %cst_14 = arith.constant dense<0.000000e+00> : vector<128x128xf32>
    %19 = tpu.matmul %17, %18, %cst_14 {dimension_numbers = #tpu.dot_dimension_numbers<[1], [0], [0], [1], [0, 0, 1, 1], [], []>} : vector<128x128xbf16>, vector<128x128xbf16>, vector<128x128xf32> -> vector<128x128xf32>
    %c0_15 = arith.constant 0 : index
    %c0_16 = arith.constant 0 : index
    %20 = vector.load %arg7[%c0_15, %c0_16] : memref<1x128xf32, #tpu.memory_space<vmem>>, vector<1x128xf32>
    %21 = vector.broadcast %20 : vector<1x128xf32> to vector<128x128xf32>
    %22 = arith.addf %19, %21 : vector<128x128xf32>
    %cst_17 = arith.constant dense<0xFF800000> : vector<128xf32>
    %23 = vector.multi_reduction <maximumf>, %22, %cst_17 [1] : vector<128x128xf32> to vector<128xf32>
    %24 = vector.shape_cast %23 : vector<128xf32> to vector<128x1xf32>
    %25 = vector.broadcast %24 : vector<128x1xf32> to vector<128x128xf32>
    %26 = arith.subf %22, %25 : vector<128x128xf32>
    %27 = math.exp %26 : vector<128x128xf32>
    %cst_18 = arith.constant dense<0.000000e+00> : vector<128xf32>
    %28 = vector.multi_reduction <add>, %27, %cst_18 [1] : vector<128x128xf32> to vector<128xf32>
    %29 = vector.shape_cast %28 : vector<128xf32> to vector<128x1xf32>
    %30 = vector.broadcast %29 : vector<128x1xf32> to vector<128x128xf32>
    %31 = arith.divf %27, %30 : vector<128x128xf32>
    %c0_19 = arith.constant 0 : index
    %c0_20 = arith.constant 0 : index
    %32 = vector.load %arg8[%c0_19, %c0_20] : memref<128x128xf32, #tpu.memory_space<vmem>>, vector<128x128xf32>
    tpu.vector_store %arg8[%c0_19, %c0_20], %31 {strides = array<i32>} : memref<128x128xf32, #tpu.memory_space<vmem>>, vector<128x128xf32>,
    return
  }
  func.func @transform_0(%arg0: i32) -> (i32, i32) {
    %c0_i32 = arith.constant 0 : i32
    %c0_i32_0 = arith.constant 0 : i32
    return %arg0, %c0_i32 : i32, i32
  }
  func.func @transform_1(%arg0: i32) -> (i32, i32) {
    %c0_i32 = arith.constant 0 : i32
    %c0_i32_0 = arith.constant 0 : i32
    %c0_i32_1 = arith.constant 0 : i32
    return %c0_i32, %c0_i32_0 : i32, i32
  }
  func.func @transform_2(%arg0: i32) -> (i32, i32) {
    %c0_i32 = arith.constant 0 : i32
    %c0_i32_0 = arith.constant 0 : i32
    %c0_i32_1 = arith.constant 0 : i32
    return %c0_i32, %c0_i32_0 : i32, i32
  }
  func.func @transform_3(%arg0: i32) -> (i32, i32) {
    %c0_i32 = arith.constant 0 : i32
    %c0_i32_0 = arith.constant 0 : i32
    %c0_i32_1 = arith.constant 0 : i32
    return %c0_i32, %c0_i32_0 : i32, i32
  }
  func.func @transform_4(%arg0: i32) -> (i32, i32) {
    %c0_i32 = arith.constant 0 : i32
    %c0_i32_0 = arith.constant 0 : i32
    %c0_i32_1 = arith.constant 0 : i32
    return %c0_i32, %c0_i32_0 : i32, i32
  }
  func.func @transform_5(%arg0: i32) -> (i32, i32) {
    %c0_i32 = arith.constant 0 : i32
    %c0_i32_0 = arith.constant 0 : i32
    %c0_i32_1 = arith.constant 0 : i32
    return %c0_i32, %c0_i32_0 : i32, i32
  }
  func.func @transform_6(%arg0: i32) -> (i32, i32) {
    %c0_i32 = arith.constant 0 : i32
    %c0_i32_0 = arith.constant 0 : i32
    %c0_i32_1 = arith.constant 0 : i32
    return %c0_i32, %c0_i32_0 : i32, i32
  }
  func.func @transform_7(%arg0: i32) -> (i32, i32) {
    %c0_i32 = arith.constant 0 : i32
    %c0_i32_0 = arith.constant 0 : i32
    return %arg0, %c0_i32 : i32, i32
  }
}

</mosaic_0001>

<bundles_post_ra>
// kernel: tpu_custom_call.1
= control target key start
LH: loop header
LB: loop body
LE: loop exit
PB: predicated region body
PF: predicated region fallthrough
CT: control target
= control target key end

     0   :  { %12 = vsyncpa [#allocation3], 0  ;;  %s2267_s0 = inlined_call_operand.hbm [shape: f32[256,128], index: 0, kind: input, shape index: {}]   ;;  %s2268_s1 = inlined_call_operand.hbm [shape: bf16[128,128], index: 1, kind: input, shape index: {}]   ;;  %s2269_s2 = inlined_call_operand.vmem [shape: f32[1,128], index: 2, kind: input, shape index: {}]   ;;  %s2270_s3 = inlined_call_operand.hbm [shape: bf16[128,128], index: 3, kind: input, shape index: {}]   ;;  %s2271_s4 = inlined_call_operand.vmem [shape: f32[1,128], index: 4, kind: input, shape index: {}]   ;;  %s2272_s5 = inlined_call_operand.hbm [shape: bf16[128,128], index: 5, kind: input, shape index: {}]   ;;  %s2273_s6 = inlined_call_operand.vmem [shape: f32[1,128], index: 6, kind: input, shape index: {}]   ;;  %s2274_s7 = inlined_call_operand.hbm [shape: f32[256,128], index: 7, kind: output, shape index: {}]  }
   0x1   :  { %14 = vsyncpa [#allocation3 + $0x1], 0 }
   0x2   :  { %15 = vsyncpa [#allocation6], 0 }
   0x3   :  { %16 = vsyncpa [#allocation9], 0 }
   0x4   :  { %17 = vsyncpa [#allocation4], 0 }
   0x5   :  { %19 = vsyncpa [#allocation4 + $0x1], 0  ;;  %s1817_s24 = smov 0   ;;  %s1819_s25 = smov 0  }
   0x6   :  { %s1821_s26 = smov 0   ;;  %s1823_s27 = smov 0  }
   0x7 LB: > { %s1838_s28 = sadd.s32 4294967295, %s1764_s27   ;;  %s1196_s29 = sadd.s32 4294967294, %s1764_s27   ;;  %s1764_s27 = sphi %s1823_s27, %s2300_s27   ;;  %s1760_s26 = sphi %s1821_s26, %s2299_s26   ;;  %s1756_s25 = sphi %s1819_s25, %s2298_s25   ;;  %s1752_s24 = sphi %s1817_s24, %s2297_s24  }
   0x8   : > { %p45_p0 = scmp.ne.s32.totalorder %s1756_s25, %s1752_s24  ;;  %p2275_p1 = scmp.eq.s32.totalorder %s1838_s28, 0 }
   0x9   : > { %p201_p3 = scmp.eq.s32.totalorder %s1196_s29, 1  ;;  %p1197_p5 = scmp.ge.s32.totalorder %s1764_s27, 1 }
   0xa   : > { %p1847_p4 = por %p2275_p1, %p45_p0  ;;  %p208_p7 = scmp.lt.s32.totalorder %s1764_s27, 3 }
   0xb   : > { %p1852_p6 = por %p201_p3, %p45_p0  ;;  %s1766_s10 = smov [#allocation5]  }
   0xc   : > { %s2279_s30 = scalar_select %p1847_p4, 1, 0 }
   0xd   : > { %s2280_s8 = scalar_select %p1852_p6, 1, 0 }
   0xe   : > { %p1857_p8 = pnand %p1197_p5, %p208_p7  ;;  %s220_s11 = sshll.u32 %s1766_s10, 4  ;;  %s1861_s11 = int_to_ptr.vmem [resolvable:$true] %s220_s11 }
   0xf   : > { %2281 = sst [smem:[#allocation15_spill]] %s2280_s8  ;;  %s1767_s13 = smov [#allocation7]  }
  0x10   : > { %s2282_s9 = scalar_select %p1857_p8, 1, 0 }
  0x11   : > { %p1421_p9 = pneg %p1857_p8  ;;  %s236_s14 = sshll.u32 %s1767_s13, 4  ;;  %s1872_s14 = int_to_ptr.vmem [resolvable:$true] %s236_s14 }
  0x12   : > { %s1768_s15 = smov [#allocation8]   ;;  %s1576_s19 = scalar_lea.hbm %s2268_s1, 1024 }
  0x13   : > { %p1868_p11 = pnand %p1421_p9, %p2275_p1  ;;  %s1874_s16 = sshll.u32 %s1768_s15, 4  ;;  %s253_s16 = int_to_ptr.vmem [resolvable:$true] %s1874_s16 }
  0x14   : > { %p1577_p12 = scmp.ne.s32.totalorder %s2268_s1, %s1576_s19  ;;  %p1583_p5 = scmp.lt.u32.totalorder %s1576_s19, %s2268_s1 }
  0x15   : > { %p1884_p13 = pneg %p1868_p11 }
  0x17   : > { %p1579_p0 = pnand %p1884_p13, %p1577_p12 }
  0x19   : > { %p1580_p3 = pneg %p1579_p0 }
  0x1b   : > { %p1585_p7 = pnand %p1583_p5, %p1580_p3 }
  0x1d   : > { %1588 = shalt.err (!%p1585_p7)
}
  0x1e   : > { %s1589_s10 = scalar_lea.vmem %s1861_s11, 1024  ;;  %p1597_p2 = scmp.lt.s32.totalorder %s1861_s11, %s1861_s11 }
  0x1f   : > { %p1590_p9 = scmp.ne.s32.totalorder %s1861_s11, %s1589_s10  ;;  %p1598_p6 = scmp.lt.s32.totalorder %s1589_s10, %s1589_s10 }
  0x21   : > { %p1592_p10 = pnand %p1590_p9, %p1884_p13  ;;  %p1599_p12 = por %p1598_p6, %p1597_p2 }
  0x23   : > { %p1593_p1 = pneg %p1592_p10 }
  0x25   : > { %p1600_p0 = pnand %p1599_p12, %p1593_p1 }
  0x27   : > { %1603 = shalt.err (!%p1600_p0)
}
  0x28   : > { %s1769_s13 = smov 64   ;;  %s1770_s15 = smov 4  }
  0x29   : > { %1424 = dma.hbm_to_vmem [thread:$0]  (!%p1868_p11), %s2268_s1, 1024, %s1861_s11, [#allocation6], %s1769_s13, %s1769_s13, %s1770_s15  }
  0x2a   : > { %s1604_s21 = scalar_lea.hbm %s2270_s3, 1024 }
  0x2b   : > { %p1605_p1 = scmp.ne.s32.totalorder %s2270_s3, %s1604_s21  ;;  %p1611_p10 = scmp.lt.u32.totalorder %s1604_s21, %s2270_s3 }
  0x2d   : > { %p1607_p2 = pnand %p1605_p1, %p1884_p13 }
  0x2f   : > { %p1608_p6 = pneg %p1607_p2 }
  0x31   : > { %p1613_p3 = pnand %p1611_p10, %p1608_p6 }
  0x33   : > { %1616 = shalt.err (!%p1613_p3)
}
  0x34   : > { %s1617_s11 = scalar_lea.vmem %s1872_s14, 1024  ;;  %p1625_p12 = scmp.lt.s32.totalorder %s1872_s14, %s1872_s14 }
  0x35   : > { %p1618_p5 = scmp.ne.s32.totalorder %s1872_s14, %s1617_s11  ;;  %p1626_p0 = scmp.lt.s32.totalorder %s1617_s11, %s1617_s11 }
  0x37   : > { %p1620_p7 = pnand %p1618_p5, %p1884_p13  ;;  %p1627_p1 = por %p1626_p0, %p1625_p12 }
  0x39   : > { %p1621_p9 = pneg %p1620_p7 }
  0x3b   : > { %p1628_p2 = pnand %p1627_p1, %p1621_p9 }
  0x3d   : > { %1631 = shalt.err (!%p1628_p2)
}
  0x3e   : > { %1427 = dma.hbm_to_vmem [thread:$0]  (!%p1868_p11), %s2270_s3, 1024, %s1872_s14, [#allocation6], %s1769_s13, %s1769_s13, %s1770_s15  }
  0x3f   : > { %s1632_s20 = scalar_lea.hbm %s2272_s5, 1024 }
  0x40   : > { %p1633_p6 = scmp.ne.s32.totalorder %s2272_s5, %s1632_s20  ;;  %p1639_p5 = scmp.lt.u32.totalorder %s1632_s20, %s2272_s5 }
  0x42   : > { %p1635_p10 = pnand %p1633_p6, %p1884_p13 }
  0x44   : > { %p1636_p3 = pneg %p1635_p10 }
  0x46   : > { %p1641_p7 = pnand %p1639_p5, %p1636_p3 }
  0x48   : > { %1644 = shalt.err (!%p1641_p7)
}
  0x49   : > { %s1645_s11 = scalar_lea.vmem %s253_s16, 1024  ;;  %p1653_p1 = scmp.lt.s32.totalorder %s253_s16, %s253_s16 }
  0x4a   : > { %p1646_p9 = scmp.ne.s32.totalorder %s253_s16, %s1645_s11  ;;  %p1654_p2 = scmp.lt.s32.totalorder %s1645_s11, %s1645_s11 }
  0x4c   : > { %p1648_p12 = pnand %p1646_p9, %p1884_p13  ;;  %p1655_p4 = por %p1654_p2, %p1653_p1 }
  0x4e   : > { %p1649_p0 = pneg %p1648_p12 }
  0x50   : > { %p1656_p8 = pnand %p1655_p4, %p1649_p0 }
  0x52   : > { %1659 = shalt.err (!%p1656_p8)
}
  0x53   : > { %1430 = dma.hbm_to_vmem [thread:$0]  (!%p1868_p11), %s2272_s5, 1024, %s253_s16, [#allocation9], %s1769_s13, %s1769_s13, %s1770_s15  }
  0x54   : > { %s1957_s22 = sadd.s32 1, %s1764_s27   ;;  %s32_s17 = sadd.s32 1, %s1760_s26 }
  0x55   : > { %s29_s12 = ssub.s32 %s1764_s27, %s1957_s22  ;;  %p39_p8 = scmp.ne.s32.totalorder %s1760_s26, %s1756_s25 }
  0x56   : > { %p30_p4 = scmp.eq.s32.totalorder %s29_s12, 0  ;;  %p40_p13 = scmp.eq.s32.totalorder %s1764_s27, 0 }
  0x57   : > { %p1442_p6 = scmp.lt.s32.totalorder %s1764_s27, 2  ;;  %p2285_p3 = scmp.eq.s32.totalorder %s1838_s28, 1 }
  0x58   : > { %s1967_s18 = scalar_select %p30_p4, %s1760_s26, %s32_s17  }
  0x59   : > { %p41_p10 = por %p40_p13, %p39_p8  ;;  %p1971_p5 = por %p2285_p3, %p39_p8 }
  0x5a   : > { %s269_s20 = sand.u32 1, %s1760_s26   ;;  %s1243_s21 = sshll.u32 %s1764_s27, 11 }
  0x5b   : > { %s1202_s16 = sshll.u32 %s269_s20, 7  ;;  %s1980_s23 = scalar_lea.hbm %s2267_s0, %s1243_s21 }
  0x5c   : > { %s273_s29 = scalar_lea.vmem [#allocation2], %s1202_s16  ;;  %p1982_p11 = pnand %p1442_p6, %p41_p10 }
  0x5d   : > { %s280_s10 = sshll.u32 %s273_s29, 4  ;;  %s1988_s14 = scalar_lea.sflag [#allocation3], %s269_s20  ;;  %s1986_s10 = int_to_ptr.vmem [resolvable:$true] %s280_s10 }
  0x5e   : > { %s1660_s8 = scalar_lea.hbm %s1980_s23, 2048  ;;  %p1662_p9 = pneg %p1982_p11 }
  0x5f   : > { %p1661_p7 = scmp.ne.s32.totalorder %s1980_s23, %s1660_s8  ;;  %s1665_s21 = scalar_lea.hbm %s2267_s0, 4096 }
  0x60   : > { %p1666_p1 = scmp.lt.u32.totalorder %s1980_s23, %s2267_s0  ;;  %p1667_p2 = scmp.lt.u32.totalorder %s1665_s21, %s1660_s8 }
  0x61   : > { %p1663_p12 = pnand %p1662_p9, %p1661_p7  ;;  %p1669_p8 = scmp.lt.u32.totalorder %s1660_s8, %s1980_s23 }
  0x62   : > { %p1668_p4 = por %p1667_p2, %p1666_p1 }
  0x63   : > { %p1664_p0 = pneg %p1663_p12 }
  0x64   : > { %p1670_p13 = por %p1669_p8, %p1668_p4 }
  0x66   : > { %p1671_p6 = pnand %p1670_p13, %p1664_p0 }
  0x68   : > { %1674 = shalt.err (!%p1671_p6)
}
  0x69   : > { %s1675_s20 = scalar_lea.vmem %s1986_s10, 2048  ;;  %s1771_s15 = smov [#allocation2]  }
  0x6a   : > { %p1676_p10 = scmp.ne.s32.totalorder %s1986_s10, %s1675_s20  ;;  %s1680_s29 = sshll.u32 %s1771_s15, 4  ;;  %s1681_s29 = int_to_ptr.vmem [resolvable:$false] %s1680_s29 }
  0x6b   : > { %s1682_s12 = scalar_lea.vmem %s1681_s29, 4096  ;;  %p1683_p12 = scmp.lt.s32.totalorder %s1986_s10, %s1681_s29 }
  0x6c   : > { %p1678_p3 = pnand %p1676_p10, %p1662_p9  ;;  %p1684_p1 = scmp.lt.s32.totalorder %s1682_s12, %s1675_s20 }
  0x6e   : > { %p1679_p7 = pneg %p1678_p3  ;;  %p1685_p2 = por %p1684_p1, %p1683_p12 }
  0x70   : > { %p1686_p4 = pnand %p1685_p2, %p1679_p7 }
  0x72   : > { %1689 = shalt.err (!%p1686_p4)
}
  0x73   : > { %s1772_s8 = smov 128   ;;  %s1773_s17 = smov 8  }
  0x74   : > { %1434 = dma.hbm_to_vmem [thread:$0]  (!%p1982_p11), %s1980_s23, 2048, %s1986_s10, %s1988_s14, %s1772_s8, %s1772_s8, %s1773_s17  }
  0x75   : > { %p2288_p9 = scmp.ne.s32.totalorder %s2282_s9, 0 }
  0x76   : > { %s2019_s21 = sand.u32 (!%p2288_p9), 1, %s1756_s25   ;;  %p2289_p0 = scmp.ne.s32.totalorder (!%p2288_p9), %s2279_s30, 0 }
  0x77   : > { %292 = sbr.rel (%p2288_p9) target bundleno = 1184 (0x4a0), region = 48  ;;  %s1206_s16 = sshll.u32 (!%p2288_p9), %s2019_s21, 7 }
  0x78   : > { %s295_s13 = scalar_lea.sflag (!%p2288_p9), [#allocation3], %s2019_s21  ;;  %s2025_s20 = scalar_lea.vmem (!%p2288_p9), [#allocation2], %s1206_s16 }
  0x7e   : > { %1735 = dma.done.wait (%p2289_p0), %s295_s13, 2048  }
  0x7f   : > { %1737 = vsyncadd (%p2289_p0), %s295_s13, 4294965248  ;;  %p2290_p11 = scmp.eq.s32.totalorder %s1838_s28, 0 }
  0x81   : > { %1739 = dma.done.wait (%p2290_p11), [#allocation6], 2048   ;;  %p2291_p8 = pmov %p2290_p11 }
  0x83   : > { %1741 = vsyncadd (%p2291_p8), [#allocation6], 4294965248  ;;  %p2292_p13 = pmov %p2291_p8 }
  0x84   : > { %p2293_p6 = pmov %p2291_p8 }
  0x85   : > { %1743 = dma.done.wait (%p2292_p13), [#allocation9], 1024  }
  0x86   : > { %1745 = vsyncadd (%p2293_p6), [#allocation9], 4294966272  ;;  %v1488_v0 = vld [vmem:[#allocation5] sm:$0xff]   ;;  %v1489_v1 = vld [vmem:[#allocation5 + $0x8] sm:$0xff]   ;;  %s2183_s15 = scalar_lea.vmem [#allocation10], %s1206_s16  ;;  %s1244_s29 = sshll.u32 %s1838_s28, 11 }
  0x87   : > { %1293 = vmatprep.subr.bf16.mxu0 %v1488_v0  ;;  %v1490_v2 = vld [vmem:[#allocation5 + $0x10] sm:$0xff]   ;;  %v1491_v3 = vld [vmem:[#allocation5 + $0x18] sm:$0xff]   ;;  %v344_v4 = vld [vmem:[%s2025_s20] sm:$0xff]  ;;  %s1094_s12 = sshll.u32 %s2183_s15, 4  ;;  %s2219_s16 = scalar_lea.hbm %s2274_s7, %s1244_s29  ;;  %s2221_s12 = int_to_ptr.vmem [resolvable:$true] %s1094_s12 }
  0x88   : > { %1294 = vmatpush3.bf16.msra.mxu0 %v1488_v0  ;;  %v345_v5 = vld [vmem:[%s2025_s20 + $0x8] sm:$0xff]  ;;  %v1492_v7 = vld [vmem:[#allocation5 + $0x20] sm:$0xff]   ;;  %v1498_v11 = vld [vmem:[#allocation7 + $0x10] sm:$0xff]   ;;  %s1081_s28 = scalar_lea.sflag [#allocation4], %s2019_s21  ;;  %s1690_s13 = scalar_lea.vmem %s2221_s12, 2048 }
  0x89   : > { %1295 = vmatprep.subr.bf16.mxu0 %v1489_v1  ;;  %v360_v6 = vpack.c.bf16 %v345_v5, %v344_v4  ;;  %v1496_v8 = vld [vmem:[#allocation7] sm:$0xff]   ;;  %v1497_v9 = vld [vmem:[#allocation7 + $0x8] sm:$0xff]   ;;  %v1494_v12 = vld [vmem:[#allocation5 + $0x30] sm:$0xff]   ;;  %p1691_p10 = scmp.ne.s32.totalorder %s2221_s12, %s1690_s13 }
  0x8a   : > { %v1493_v10 = vld [vmem:[#allocation5 + $0x28] sm:$0xff]   ;;  %1325 = vmatprep.subr.bf16.mxu1 %v1496_v8  ;;  %v1499_v13 = vld [vmem:[#allocation7 + $0x18] sm:$0xff]   ;;  %v1500_v15 = vld [vmem:[#allocation7 + $0x20] sm:$0xff]  }
  0x8b   : > { %1309 = vmatprep.mubr.bf16.mxu0 %v360_v6  ;;  %1326 = vmatpush3.bf16.msra.mxu1 %v1496_v8  ;;  %v1495_v14 = vld [vmem:[#allocation5 + $0x38] sm:$0xff]   ;;  %v346_v16 = vld [vmem:[%s2025_s20 + $0x10] sm:$0xff]  ;;  %v348_v18 = vld [vmem:[%s2025_s20 + $0x20] sm:$0xff]  ;;  %p1692_p3 = pnand %p1691_p10, %p1971_p5 }
  0x8c   : > { %1296 = vmatpush3.bf16.msra.mxu0 %v1489_v1  ;;  %1327 = vmatprep.subr.bf16.mxu1 %v1497_v9  ;;  %v347_v17 = vld [vmem:[%s2025_s20 + $0x18] sm:$0xff]  ;;  %v349_v19 = vld [vmem:[%s2025_s20 + $0x28] sm:$0xff]  ;;  %v350_v23 = vld [vmem:[%s2025_s20 + $0x30] sm:$0xff] }
  0x8d   : > { %1297 = vmatprep.subr.bf16.mxu0 %v1490_v2  ;;  %v361_v20 = vpack.c.bf16 %v347_v17, %v346_v16  ;;  %v1501_v21 = vld [vmem:[#allocation7 + $0x28] sm:$0xff]   ;;  %v362_v22 = vpack.c.bf16 %v349_v19, %v348_v18  ;;  %v351_v24 = vld [vmem:[%s2025_s20 + $0x38] sm:$0xff]  ;;  %v352_v25 = vld [vmem:[%s2025_s20 + $0x40] sm:$0xff]  ;;  %p1693_p7 = pneg %p1692_p3 }
  0x8e   : > { %v353_v26 = vld [vmem:[%s2025_s20 + $0x48] sm:$0xff]  ;;  %v363_v27 = vpack.c.bf16 %v351_v24, %v350_v23  ;;  %v354_v29 = vld [vmem:[%s2025_s20 + $0x50] sm:$0xff]  ;;  %v355_v30 = vld [vmem:[%s2025_s20 + $0x58] sm:$0xff] }
  0x8f   : > { %1328 = vmatpush3.bf16.msra.mxu1 %v1497_v9  ;;  %v364_v28 = vpack.c.bf16 %v353_v26, %v352_v25  ;;  %v356_v31 = vld [vmem:[%s2025_s20 + $0x60] sm:$0xff]  ;;  %v357_v32 = vld [vmem:[%s2025_s20 + $0x68] sm:$0xff]  ;;  %v365_v33 = vpack.c.bf16 %v355_v30, %v354_v29  ;;  %v358_v35 = vld [vmem:[%s2025_s20 + $0x70] sm:$0xff] }
  0x90   : > { %1298 = vmatpush3.bf16.msra.mxu0 %v1490_v2  ;;  %1329 = vmatprep.subr.bf16.mxu1 %v1498_v11  ;;  %v366_v34 = vpack.c.bf16 %v357_v32, %v356_v31  ;;  %v359_v36 = vld [vmem:[%s2025_s20 + $0x78] sm:$0xff]  ;;  %v1502_v38 = vld [vmem:[#allocation7 + $0x30] sm:$0xff]   ;;  %v1504_v40 = vld [vmem:[#allocation8] sm:$0xff]   ;;  %s1774_s20 = smov [#allocation10]  }
  0x91   : > { %1299 = vmatprep.subr.bf16.mxu0 %v1491_v3  ;;  %v367_v37 = vpack.c.bf16 %v359_v36, %v358_v35  ;;  %v1503_v39 = vld [vmem:[#allocation7 + $0x38] sm:$0xff]   ;;  %v1505_v41 = vld [vmem:[#allocation8 + $0x8] sm:$0xff]   ;;  %v1506_v42 = vld [vmem:[#allocation8 + $0x10] sm:$0xff]   ;;  %s1694_s30 = sshll.u32 %s1774_s20, 4  ;;  %s1695_s30 = int_to_ptr.vmem [resolvable:$false] %s1694_s30 }
  0x92   : > { %v2055_v43 = vld [vmem:[#allocation8 + $0x18] sm:$0xff]   ;;  %v2058_v44 = vld [vmem:[#allocation8 + $0x20] sm:$0xff]   ;;  %v2062_v45 = vld [vmem:[#allocation8 + $0x28] sm:$0xff]   ;;  %s1696_s9 = scalar_lea.vmem %s1695_s30, 4096  ;;  %p1697_p12 = scmp.lt.s32.totalorder %s2221_s12, %s1695_s30 }
  0x93   : > { %1330 = vmatpush3.bf16.msra.mxu1 %v1498_v11  ;;  %v2070_v46 = vld [vmem:[%s2269_s2] ss:$0 sm:$0xff]  ;;  %p1698_p1 = scmp.lt.s32.totalorder %s1696_s9, %s1690_s13 }
  0x94   : > { %1300 = vmatpush3.bf16.msra.mxu0 %v1491_v3  ;;  %1331 = vmatprep.subr.bf16.mxu1 %v1499_v13 }
  0x95   : > { %1301 = vmatprep.subr.bf16.mxu0 %v1492_v7  ;;  %p1699_p2 = por %p1698_p1, %p1697_p12 }
  0x97   : > { %1332 = vmatpush3.bf16.msra.mxu1 %v1499_v13  ;;  %p1700_p4 = pnand %p1699_p2, %p1693_p7 }
  0x98   : > { %1302 = vmatpush3.bf16.msra.mxu0 %v1492_v7  ;;  %1333 = vmatprep.subr.bf16.mxu1 %v1500_v15 }
  0x99   : > { %1303 = vmatprep.subr.bf16.mxu0 %v1493_v10 }
  0x9b   : > { %1334 = vmatpush3.bf16.msra.mxu1 %v1500_v15 }
  0x9c   : > { %1304 = vmatpush3.bf16.msra.mxu0 %v1493_v10  ;;  %1335 = vmatprep.subr.bf16.mxu1 %v1501_v21 }
  0x9d   : > { %1305 = vmatprep.subr.bf16.mxu0 %v1494_v12 }
  0x9f   : > { %1336 = vmatpush3.bf16.msra.mxu1 %v1501_v21 }
  0xa0   : > { %1306 = vmatpush3.bf16.msra.mxu0 %v1494_v12  ;;  %1337 = vmatprep.subr.bf16.mxu1 %v1502_v38 }
  0xa1   : > { %1307 = vmatprep.subr.bf16.mxu0 %v1495_v14 }
  0xa3   : > { %1338 = vmatpush3.bf16.msra.mxu1 %v1502_v38 }
  0xa4   : > { %1308 = vmatpush3.bf16.msra.mxu0 %v1495_v14  ;;  %1339 = vmatprep.subr.bf16.mxu1 %v1503_v39 }
  0xa5   : > { %1357 = vmatprep.subr.bf16.mxu0 %v1504_v40 }
  0xa7   : > { %1310 = vmatmul.mubr.bf16.vlgmr.msra.gmra.mrb[0].mxu0 %v361_v20  ;;  %1340 = vmatpush3.bf16.msra.mxu1 %v1503_v39  ;;  %v1510_v39 = vld [vmem:[#allocation8 + $0x30] sm:$0xff]  }
  0xa8   : > { %1313 = vmatprep.mubr.bf16.mxu0 %v362_v22  ;;  %1389 = vmatprep.subr.bf16.mxu1 %v1504_v40 }
  0xa9   : > { %1358 = vmatpush3.bf16.msra.mxu0 %v1504_v40 }
  0xaa   : > { %1359 = vmatprep.subr.bf16.mxu0 %v1505_v41 }
  0xad   : > { %1360 = vmatpush3.bf16.msra.mxu0 %v1505_v41 }
  0xae   : > { %1361 = vmatprep.subr.bf16.mxu0 %v1506_v42 }
  0xaf   : > { %1314 = vmatmul.mubr.bf16.gmra.mrb[4].mxu0 %v363_v27 }
  0xb0   : > { %1317 = vmatprep.mubr.bf16.mxu0 %v364_v28 }
  0xb1   : > { %1362 = vmatpush3.bf16.msra.mxu0 %v1506_v42 }
  0xb2   : > { %1363 = vmatprep.subr.bf16.mxu0 %v2055_v43 }
  0xb5   : > { %1364 = vmatpush3.bf16.msra.mxu0 %v2055_v43 }
  0xb6   : > { %1365 = vmatprep.subr.bf16.mxu0 %v2058_v44 }
  0xb7   : > { %1318 = vmatmul.mubr.bf16.gmra.mrb[8].mxu0 %v365_v33 }
  0xb8   : > { %1321 = vmatprep.mubr.bf16.mxu0 %v366_v34 }
  0xb9   : > { %1366 = vmatpush3.bf16.msra.mxu0 %v2058_v44 }
  0xba   : > { %1367 = vmatprep.subr.bf16.mxu0 %v2062_v45 }
  0xbd   : > { %1368 = vmatpush3.bf16.msra.mxu0 %v2062_v45 }
  0xbe   : > { %1369 = vmatprep.subr.bf16.mxu0 %v1510_v39 }
  0xbf   : > { %1322 = vmatmul.mubr.bf16.gmra.mrb[12].mxu0 %v367_v37 }
  0xc1   : > { %1370 = vmatpush3.bf16.msra.mxu0 %v1510_v39 }
 0x17a   : > { %v1311_v47 = vpop.f32.mrb[0].mxu0 }
 0x17b   : > { %v482_v48 = vadd.f32 %v1311_v47, %v2070_v46  ;;  %v473_v49 = vpop.f32.mrb[1].mxu0 }
 0x17c   : > { %v474_v50 = vadd.f32 %v2070_v46, %v473_v49  ;;  %v1312_v51 = vpop.f32.mrb[2].mxu0 }
 0x17d   : > { %v485_v52 = vadd.f32 %v1312_v51, %v2070_v46  ;;  %v476_v53 = vpop.f32.mrb[3].mxu0  ;;  %v538_v55 = vmax.f32 %v482_v48, 0.0 }
 0x17e   : > { %v477_v54 = vadd.f32 %v2070_v46, %v476_v53  ;;  %v536_v57 = vmax.f32 %v474_v50, 0.0 }
 0x17f   : > { %v539_v56 = vmax.f32 %v485_v52, 0.0 }
 0x180   : > { %v537_v58 = vmax.f32 %v477_v54, 0.0 }
 0x181   : > { %v553_v59 = vpack.c.bf16 %v539_v56, %v538_v55 }
 0x182   : > { %v1315_v60 = vpop.f32.mrb[4].mxu0  ;;  %v552_v61 = vpack.c.bf16 %v537_v58, %v536_v57 }
 0x183   : > { %v498_v62 = vadd.f32 %v1315_v60, %v2070_v46  ;;  %v489_v63 = vpop.f32.mrb[5].mxu0 }
 0x184   : > { %v490_v0 = vadd.f32 %v2070_v46, %v489_v63  ;;  %v1316_v1 = vpop.f32.mrb[6].mxu0  ;;  %1341 = vmatprep.mubr.bf16.mxu1 %v552_v61 }
 0x185   : > { %v542_v2 = vmax.f32 %v498_v62, 0.0  ;;  %v501_v3 = vadd.f32 %v1316_v1, %v2070_v46  ;;  %v492_v4 = vpop.f32.mrb[7].mxu0  ;;  %1342 = vmatmul.mubr.bf16.vlgmr.msra.gmra.mrb[0].mxu1 %v553_v59 }
 0x186   : > { %v493_v5 = vadd.f32 %v2070_v46, %v492_v4  ;;  %1397 = vmatpush3.bf16.msra.mxu1 %v1504_v40  ;;  %v540_v7 = vmax.f32 %v490_v0, 0.0  ;;  %v1511_v40 = vld [vmem:[#allocation8 + $0x38] sm:$0xff]  }
 0x187   : > { %v543_v6 = vmax.f32 %v501_v3, 0.0  ;;  %1390 = vmatprep.subr.bf16.mxu1 %v1505_v41  ;;  %1371 = vmatprep.subr.bf16.mxu0 %v1511_v40 }
 0x188   : > { %v541_v8 = vmax.f32 %v493_v5, 0.0  ;;  %1372 = vmatpush3.bf16.msra.mxu0 %v1511_v40 }
 0x189   : > { %v555_v9 = vpack.c.bf16 %v543_v6, %v542_v2 }
 0x18a   : > { %v554_v10 = vpack.c.bf16 %v541_v8, %v540_v7  ;;  %v1319_v11 = vpop.f32.mrb[8].mxu0  ;;  %1398 = vmatpush3.bf16.msra.mxu1 %v1505_v41  ;;  %v1220_v41 = vld [vmem:[%s2271_s4] ss:$0 sm:$0xff] }
 0x18b   : > { %v514_v12 = vadd.f32 %v1319_v11, %v2070_v46  ;;  %v505_v13 = vpop.f32.mrb[9].mxu0  ;;  %1391 = vmatprep.subr.bf16.mxu1 %v1506_v42 }
 0x18c   : > { %v506_v14 = vadd.f32 %v2070_v46, %v505_v13  ;;  %v1320_v15 = vpop.f32.mrb[10].mxu0  ;;  %1345 = vmatprep.mubr.bf16.mxu1 %v554_v10 }
 0x18d   : > { %v546_v16 = vmax.f32 %v514_v12, 0.0  ;;  %v517_v17 = vadd.f32 %v1320_v15, %v2070_v46  ;;  %v508_v18 = vpop.f32.mrb[11].mxu0  ;;  %1346 = vmatmul.mubr.bf16.gmra.mrb[4].mxu1 %v555_v9 }
 0x18e   : > { %v509_v19 = vadd.f32 %v2070_v46, %v508_v18  ;;  %1399 = vmatpush3.bf16.msra.mxu1 %v1506_v42  ;;  %v544_v21 = vmax.f32 %v506_v14, 0.0 }
 0x18f   : > { %v547_v20 = vmax.f32 %v517_v17, 0.0  ;;  %1392 = vmatprep.subr.bf16.mxu1 %v2055_v43 }
 0x190   : > { %v545_v22 = vmax.f32 %v509_v19, 0.0 }
 0x191   : > { %v557_v23 = vpack.c.bf16 %v547_v20, %v546_v16 }
 0x192   : > { %v556_v24 = vpack.c.bf16 %v545_v22, %v544_v21  ;;  %v1323_v25 = vpop.f32.mrb[12].mxu0  ;;  %1400 = vmatpush3.bf16.msra.mxu1 %v2055_v43 }
 0x193   : > { %v530_v26 = vadd.f32 %v1323_v25, %v2070_v46  ;;  %v521_v27 = vpop.f32.mrb[13].mxu0  ;;  %1393 = vmatprep.subr.bf16.mxu1 %v2058_v44 }
 0x194   : > { %v522_v28 = vadd.f32 %v2070_v46, %v521_v27  ;;  %v1324_v29 = vpop.f32.mrb[14].mxu0  ;;  %1349 = vmatprep.mubr.bf16.mxu1 %v556_v24 }
 0x195   : > { %v550_v30 = vmax.f32 %v530_v26, 0.0  ;;  %v533_v31 = vadd.f32 %v1324_v29, %v2070_v46  ;;  %v524_v32 = vpop.f32.mrb[15].mxu0  ;;  %1350 = vmatmul.mubr.bf16.gmra.mrb[8].mxu1 %v557_v23 }
 0x196   : > { %v525_v33 = vadd.f32 %v2070_v46, %v524_v32  ;;  %1401 = vmatpush3.bf16.msra.mxu1 %v2058_v44  ;;  %v548_v35 = vmax.f32 %v522_v28, 0.0 }
 0x197   : > { %v551_v34 = vmax.f32 %v533_v31, 0.0  ;;  %1394 = vmatprep.subr.bf16.mxu1 %v2062_v45 }
 0x198   : > { %v549_v36 = vmax.f32 %v525_v33, 0.0 }
 0x199   : > { %v559_v37 = vpack.c.bf16 %v551_v34, %v550_v30  ;;  %v1229_v34 = vld [vmem:[%s2273_s6] ss:$0 sm:$0xff] }
 0x19a   : > { %v558_v38 = vpack.c.bf16 %v549_v36, %v548_v35  ;;  %1402 = vmatpush3.bf16.msra.mxu1 %v2062_v45 }
 0x19b   : > { %1395 = vmatprep.subr.bf16.mxu1 %v1510_v39 }
 0x19c   : > { %1353 = vmatprep.mubr.bf16.mxu1 %v558_v38 }
 0x19d   : > { %1354 = vmatmul.mubr.bf16.gmra.mrb[12].mxu1 %v559_v37 }
 0x19e   : > { %1403 = vmatpush3.bf16.msra.mxu1 %v1510_v39 }
 0x19f   : > { %1396 = vmatprep.subr.bf16.mxu1 %v1511_v40 }
 0x1a2   : > { %1404 = vmatpush3.bf16.msra.mxu1 %v1511_v40 }
 0x258   : > { %v1343_v42 = vpop.f32.mrb[0].mxu1 }
 0x259   : > { %v674_v43 = vadd.f32 %v1343_v42, %v1220_v41  ;;  %v665_v44 = vpop.f32.mrb[1].mxu1 }
 0x25a   : > { %v666_v45 = vadd.f32 %v1220_v41, %v665_v44  ;;  %v1344_v46 = vpop.f32.mrb[2].mxu1 }
 0x25b   : > { %v677_v47 = vadd.f32 %v1344_v46, %v1220_v41  ;;  %v668_v48 = vpop.f32.mrb[3].mxu1  ;;  %v730_v50 = vmax.f32 %v674_v43, 0.0 }
 0x25c   : > { %v669_v49 = vadd.f32 %v1220_v41, %v668_v48  ;;  %v728_v52 = vmax.f32 %v666_v45, 0.0 }
 0x25d   : > { %v731_v51 = vmax.f32 %v677_v47, 0.0 }
 0x25e   : > { %v729_v53 = vmax.f32 %v669_v49, 0.0 }
 0x25f   : > { %v745_v54 = vpack.c.bf16 %v731_v51, %v730_v50 }
 0x260   : > { %v744_v55 = vpack.c.bf16 %v729_v53, %v728_v52  ;;  %v1347_v56 = vpop.f32.mrb[4].mxu1 }
 0x261   : > { %v690_v57 = vadd.f32 %v1347_v56, %v1220_v41  ;;  %v681_v58 = vpop.f32.mrb[5].mxu1 }
 0x262   : > { %v682_v59 = vadd.f32 %v1220_v41, %v681_v58  ;;  %v1348_v60 = vpop.f32.mrb[6].mxu1  ;;  %1373 = vmatprep.mubr.bf16.mxu0 %v744_v55 }
 0x263   : > { %v693_v61 = vadd.f32 %v1348_v60, %v1220_v41  ;;  %v684_v62 = vpop.f32.mrb[7].mxu1  ;;  %1374 = vmatmul.mubr.bf16.vlgmr.msra.gmra.mrb[16].mxu0 %v745_v54  ;;  %v734_v0 = vmax.f32 %v690_v57, 0.0 }
 0x264   : > { %v685_v63 = vadd.f32 %v1220_v41, %v684_v62  ;;  %v732_v2 = vmax.f32 %v682_v59, 0.0 }
 0x265   : > { %v735_v1 = vmax.f32 %v693_v61, 0.0 }
 0x266   : > { %v733_v3 = vmax.f32 %v685_v63, 0.0 }
 0x267   : > { %v747_v4 = vpack.c.bf16 %v735_v1, %v734_v0 }
 0x268   : > { %v746_v5 = vpack.c.bf16 %v733_v3, %v732_v2  ;;  %v1351_v6 = vpop.f32.mrb[8].mxu1 }
 0x269   : > { %v706_v7 = vadd.f32 %v1351_v6, %v1220_v41  ;;  %v697_v8 = vpop.f32.mrb[9].mxu1 }
 0x26a   : > { %v698_v9 = vadd.f32 %v1220_v41, %v697_v8  ;;  %v1352_v10 = vpop.f32.mrb[10].mxu1  ;;  %1377 = vmatprep.mubr.bf16.mxu0 %v746_v5 }
 0x26b   : > { %v709_v11 = vadd.f32 %v1352_v10, %v1220_v41  ;;  %v700_v12 = vpop.f32.mrb[11].mxu1  ;;  %1378 = vmatmul.mubr.bf16.gmra.mrb[20].mxu0 %v747_v4  ;;  %v738_v14 = vmax.f32 %v706_v7, 0.0 }
 0x26c   : > { %v701_v13 = vadd.f32 %v1220_v41, %v700_v12  ;;  %v736_v16 = vmax.f32 %v698_v9, 0.0 }
 0x26d   : > { %v739_v15 = vmax.f32 %v709_v11, 0.0 }
 0x26e   : > { %v737_v17 = vmax.f32 %v701_v13, 0.0 }
 0x26f   : > { %v749_v18 = vpack.c.bf16 %v739_v15, %v738_v14 }
 0x270   : > { %v748_v19 = vpack.c.bf16 %v737_v17, %v736_v16  ;;  %v1355_v20 = vpop.f32.mrb[12].mxu1 }
 0x271   : > { %v722_v21 = vadd.f32 %v1355_v20, %v1220_v41  ;;  %v713_v22 = vpop.f32.mrb[13].mxu1 }
 0x272   : > { %v714_v23 = vadd.f32 %v1220_v41, %v713_v22  ;;  %v1356_v24 = vpop.f32.mrb[14].mxu1  ;;  %1381 = vmatprep.mubr.bf16.mxu1 %v748_v19 }
 0x273   : > { %v725_v25 = vadd.f32 %v1356_v24, %v1220_v41  ;;  %v716_v26 = vpop.f32.mrb[15].mxu1  ;;  %1382 = vmatmul.mubr.bf16.vlgmr.msra.gmra.mrb[16].mxu1 %v749_v18  ;;  %v742_v28 = vmax.f32 %v722_v21, 0.0 }
 0x274   : > { %v717_v27 = vadd.f32 %v1220_v41, %v716_v26  ;;  %v740_v30 = vmax.f32 %v714_v23, 0.0 }
 0x275   : > { %v743_v29 = vmax.f32 %v725_v25, 0.0 }
 0x276   : > { %v741_v31 = vmax.f32 %v717_v27, 0.0 }
 0x277   : > { %v751_v32 = vpack.c.bf16 %v743_v29, %v742_v28 }
 0x278   : > { %v750_v33 = vpack.c.bf16 %v741_v31, %v740_v30 }
 0x27a   : > { %1385 = vmatprep.mubr.bf16.mxu1 %v750_v33 }
 0x27b   : > { %1386 = vmatmul.mubr.bf16.gmra.mrb[20].mxu1 %v751_v32 }
 0x336   : > { %v1375_v35 = vpop.f32.mrb[16].mxu0 }
 0x337   : > { %v866_v36 = vadd.f32 %v1375_v35, %v1229_v34  ;;  %v857_v37 = vpop.f32.mrb[17].mxu0 }
 0x338   : > { %v858_v38 = vadd.f32 %v1229_v34, %v857_v37  ;;  %v1376_v39 = vpop.f32.mrb[18].mxu0 }
 0x339   : > { %924 = vmax.xlane.f32.xlu1 %v866_v36  ;;  %v860_v40 = vpop.f32.mrb[19].mxu0  ;;  %v869_v41 = vadd.f32 %v1376_v39, %v1229_v34 }
 0x33a   : > { %920 = vmax.xlane.f32.xlu0 %v858_v38  ;;  %v861_v42 = vadd.f32 %v1229_v34, %v860_v40 }
 0x33d   : > { %926 = vmax.xlane.f32.xlu1 %v869_v41 }
 0x33e   : > { %v1379_v43 = vpop.f32.mrb[20].mxu0  ;;  %922 = vmax.xlane.f32.xlu0 %v861_v42 }
 0x33f   : > { %v882_v44 = vadd.f32 %v1379_v43, %v1229_v34  ;;  %v873_v45 = vpop.f32.mrb[21].mxu0 }
 0x340   : > { %v1380_v46 = vpop.f32.mrb[22].mxu0  ;;  %v874_v49 = vadd.f32 %v1229_v34, %v873_v45 }
 0x341   : > { %v885_v47 = vadd.f32 %v1380_v46, %v1229_v34  ;;  %v876_v48 = vpop.f32.mrb[23].mxu0 }
 0x342   : > { %932 = vmax.xlane.f32.xlu0 %v882_v44  ;;  %v877_v50 = vadd.f32 %v1229_v34, %v876_v48 }
 0x343   : > { %934 = vmax.xlane.f32.xlu1 %v885_v47 }
 0x346   : > { %v1383_v51 = vpop.f32.mrb[16].mxu1  ;;  %928 = vmax.xlane.f32.xlu0 %v874_v49 }
 0x347   : > { %v2100_v52 = vadd.f32 %v1383_v51, %v1229_v34  ;;  %v889_v53 = vpop.f32.mrb[17].mxu1  ;;  %930 = vmax.xlane.f32.xlu1 %v877_v50 }
 0x348   : > { %v1384_v54 = vpop.f32.mrb[18].mxu1  ;;  %v2106_v57 = vadd.f32 %v1229_v34, %v889_v53 }
 0x349   : > { %v2102_v55 = vadd.f32 %v1384_v54, %v1229_v34  ;;  %v892_v56 = vpop.f32.mrb[19].mxu1 }
 0x34a   : > { %940 = vmax.xlane.f32.xlu0 %v2100_v52  ;;  %v2108_v58 = vadd.f32 %v1229_v34, %v892_v56 }
 0x34b   : > { %942 = vmax.xlane.f32.xlu1 %v2102_v55 }
 0x34e   : > { %v1387_v59 = vpop.f32.mrb[20].mxu1  ;;  %936 = vmax.xlane.f32.xlu0 %v2106_v57 }
 0x34f   : > { %v905_v60 = vpop.f32.mrb[21].mxu1  ;;  %938 = vmax.xlane.f32.xlu1 %v2108_v58  ;;  %v2117_v1 = vadd.f32 %v1387_v59, %v1229_v34 }
 0x350   : > { %v2112_v61 = vadd.f32 %v1229_v34, %v905_v60  ;;  %v1388_v62 = vpop.f32.mrb[22].mxu1 }
 0x351   : > { %v908_v63 = vpop.f32.mrb[23].mxu1  ;;  %v2120_v2 = vadd.f32 %v1388_v62, %v1229_v34 }
 0x352   : > { %v2114_v0 = vadd.f32 %v1229_v34, %v908_v63  ;;  %944 = vmax.xlane.f32.xlu0 %v2112_v61 }
 0x354   : > { %946 = vmax.xlane.f32.xlu1 %v2114_v0 }
 0x356   : > { %948 = vmax.xlane.f32.xlu0 %v2117_v1 }
 0x358   : > { %950 = vmax.xlane.f32.xlu1 %v2120_v2 }
 0x3c6   : > { %v925_v3 = vpop.xlane.xlu1 %924 }
 0x3c7   : > { %v954_v4 = vsub.f32 %v866_v36, %v925_v3  ;;  %v921_v5 = vpop.xlane.xlu0 %920 }
 0x3c8   : > { %v952_v6 = vsub.f32 %v858_v38, %v921_v5 }
 0x3c9   : > { %v972_v7 = vmul.f32 1.442695, %v954_v4 }
 0x3ca   : > { %v968_v8 = vmul.f32 1.442695, %v952_v6  ;;  %v927_v9 = vpop.xlane.xlu1 %926 }
 0x3cb   : > { %1512 = vpow2.f32 %v972_v7  ;;  %v955_v10 = vsub.f32 %v869_v41, %v927_v9  ;;  %v923_v11 = vpop.xlane.xlu0 %922 }
 0x3cc   : > { %v953_v12 = vsub.f32 %v861_v42, %v923_v11  ;;  %1514 = vpow2.f32 %v968_v8 }
 0x3cd   : > { %v974_v13 = vmul.f32 1.442695, %v955_v10 }
 0x3ce   : > { %v970_v14 = vmul.f32 1.442695, %v953_v12 }
 0x3cf   : > { %1516 = vpow2.f32 %v974_v13  ;;  %v933_v15 = vpop.xlane.xlu0 %932 }
 0x3d0   : > { %v958_v16 = vsub.f32 %v882_v44, %v933_v15  ;;  %v935_v17 = vpop.xlane.xlu1 %934  ;;  %1518 = vpow2.f32 %v970_v14 }
 0x3d1   : > { %v959_v18 = vsub.f32 %v885_v47, %v935_v17 }
 0x3d2   : > { %v980_v19 = vmul.f32 1.442695, %v958_v16 }
 0x3d3   : > { %v982_v20 = vmul.f32 1.442695, %v959_v18  ;;  %v929_v21 = vpop.xlane.xlu0 %928 }
 0x3d4   : > { %1520 = vpow2.f32 %v980_v19  ;;  %v956_v22 = vsub.f32 %v874_v49, %v929_v21  ;;  %v931_v23 = vpop.xlane.xlu1 %930 }
 0x3d5   : > { %v2124_v24 = vpop.eup %1512  ;;  %v957_v25 = vsub.f32 %v877_v50, %v931_v23  ;;  %1522 = vpow2.f32 %v982_v20 }
 0x3d6   : > { %v976_v26 = vmul.f32 1.442695, %v956_v22  ;;  %1004 = vadd.xlane.f32.xlu0 %v2124_v24  ;;  %v2127_v29 = vpop.eup %1514 }
 0x3d7   : > { %v978_v27 = vmul.f32 1.442695, %v957_v25  ;;  %v941_v28 = vpop.xlane.xlu0 %940 }
 0x3d8   : > { %1524 = vpow2.f32 %v976_v26  ;;  %v962_v30 = vsub.f32 %v2100_v52, %v941_v28  ;;  %v943_v31 = vpop.xlane.xlu1 %942 }
 0x3d9   : > { %v2130_v32 = vpop.eup %1516  ;;  %v963_v33 = vsub.f32 %v2102_v55, %v943_v31  ;;  %1526 = vpow2.f32 %v978_v27 }
 0x3da   : > { %v988_v34 = vmul.f32 1.442695, %v962_v30  ;;  %1006 = vadd.xlane.f32.xlu1 %v2130_v32  ;;  %1000 = vadd.xlane.f32.xlu0 %v2127_v29  ;;  %v2136_v39 = vpop.eup %1518 }
 0x3db   : > { %v990_v35 = vmul.f32 1.442695, %v963_v33  ;;  %v937_v36 = vpop.xlane.xlu0 %936 }
 0x3dc   : > { %1528 = vpow2.f32 %v988_v34  ;;  %v960_v37 = vsub.f32 %v2106_v57, %v937_v36  ;;  %v939_v38 = vpop.xlane.xlu1 %938 }
 0x3dd   : > { %v961_v40 = vsub.f32 %v2108_v58, %v939_v38  ;;  %1530 = vpow2.f32 %v990_v35 }
 0x3de   : > { %v2139_v41 = vpop.eup %1520  ;;  %v984_v42 = vmul.f32 1.442695, %v960_v37  ;;  %1002 = vadd.xlane.f32.xlu1 %v2136_v39 }
 0x3df   : > { %v986_v43 = vmul.f32 1.442695, %v961_v40  ;;  %1012 = vadd.xlane.f32.xlu0 %v2139_v41  ;;  %v945_v44 = vpop.xlane.xlu0 %944  ;;  %v2144_v46 = vpop.eup %1522 }
 0x3e0   : > { %1532 = vpow2.f32 %v984_v42  ;;  %v964_v45 = vsub.f32 %v2112_v61, %v945_v44 }
 0x3e1   : > { %v947_v47 = vpop.xlane.xlu1 %946  ;;  %1534 = vpow2.f32 %v986_v43 }
 0x3e2   : > { %v2146_v48 = vpop.eup %1524  ;;  %v992_v49 = vmul.f32 1.442695, %v964_v45  ;;  %v965_v50 = vsub.f32 %v2114_v0, %v947_v47  ;;  %1014 = vadd.xlane.f32.xlu1 %v2144_v46 }
 0x3e3   : > { %1008 = vadd.xlane.f32.xlu0 %v2146_v48  ;;  %v949_v51 = vpop.xlane.xlu0 %948  ;;  %v2152_v54 = vpop.eup %1526 }
 0x3e4   : > { %1536 = vpow2.f32 %v992_v49  ;;  %v994_v52 = vmul.f32 1.442695, %v965_v50  ;;  %v966_v53 = vsub.f32 %v2117_v1, %v949_v51 }
 0x3e5   : > { %v951_v55 = vpop.xlane.xlu1 %950 }
 0x3e6   : > { %v2154_v56 = vpop.eup %1528  ;;  %1538 = vpow2.f32 %v994_v52  ;;  %v996_v57 = vmul.f32 1.442695, %v966_v53  ;;  %v967_v58 = vsub.f32 %v2120_v2, %v951_v55  ;;  %1010 = vadd.xlane.f32.xlu1 %v2152_v54 }
 0x3e7   : > { %1020 = vadd.xlane.f32.xlu0 %v2154_v56  ;;  %v2159_v60 = vpop.eup %1530 }
 0x3e8   : > { %1540 = vpow2.f32 %v996_v57  ;;  %v998_v59 = vmul.f32 1.442695, %v967_v58 }
 0x3ea   : > { %v2161_v61 = vpop.eup %1532  ;;  %1542 = vpow2.f32 %v998_v59  ;;  %1022 = vadd.xlane.f32.xlu1 %v2159_v60 }
 0x3eb   : > { %1016 = vadd.xlane.f32.xlu0 %v2161_v61  ;;  %v2165_v62 = vpop.eup %1534 }
 0x3ee   : > { %v2167_v63 = vpop.eup %1536  ;;  %1018 = vadd.xlane.f32.xlu1 %v2165_v62 }
 0x3ef   : > { %1024 = vadd.xlane.f32.xlu0 %v2167_v63 }
 0x3f0   : > { %v2171_v0 = vpop.eup %1538 }
 0x3f2   : > { %v2173_v1 = vpop.eup %1540  ;;  %1026 = vadd.xlane.f32.xlu1 %v2171_v0 }
 0x3f3   : > { %1028 = vadd.xlane.f32.xlu0 %v2173_v1 }
 0x3f4   : > { %v2177_v2 = vpop.eup %1542 }
 0x3f6   : > { %1030 = vadd.xlane.f32.xlu1 %v2177_v2 }
 0x463   : > { %v1005_v3 = vpop.xlane.xlu0 %1004 }
 0x464   : > { %1544 = vrcp.f32 %v1005_v3 }
 0x467   : > { %v1007_v4 = vpop.xlane.xlu1 %1006  ;;  %v1001_v5 = vpop.xlane.xlu0 %1000 }
 0x468   : > { %1546 = vrcp.f32 %v1007_v4 }
 0x469   : > { %1548 = vrcp.f32 %v1001_v5 }
 0x46b   : > { %v1003_v6 = vpop.xlane.xlu1 %1002 }
 0x46c   : > { %1550 = vrcp.f32 %v1003_v6  ;;  %v1013_v7 = vpop.xlane.xlu0 %1012 }
 0x46d   : > { %1552 = vrcp.f32 %v1013_v7 }
 0x46e   : > { %v1545_v8 = vpop.eup %1544 }
 0x46f   : > { %v1037_v9 = vmul.f32 %v1545_v8, %v2124_v24  ;;  %v1015_v10 = vpop.xlane.xlu1 %1014 }
 0x470   : > { %1554 = vrcp.f32 %v1015_v10  ;;  %v1009_v11 = vpop.xlane.xlu0 %1008 }
 0x471   : > { %1066 = vst [vmem:[%s2183_s15 + $0x10] sm:$0xff] %v1037_v9  ;;  %1556 = vrcp.f32 %v1009_v11 }
 0x472   : > { %v1547_v12 = vpop.eup %1546 }
 0x473   : > { %v1549_v13 = vpop.eup %1548  ;;  %v1039_v14 = vmul.f32 %v1547_v12, %v2130_v32  ;;  %v1011_v15 = vpop.xlane.xlu1 %1010 }
 0x474   : > { %v1033_v16 = vmul.f32 %v1549_v13, %v2127_v29  ;;  %1558 = vrcp.f32 %v1011_v15  ;;  %v1021_v17 = vpop.xlane.xlu0 %1020 }
 0x475   : > { %1067 = vst [vmem:[%s2183_s15 + $0x18] sm:$0xff] %v1039_v14  ;;  %1560 = vrcp.f32 %v1021_v17 }
 0x476   : > { %v1551_v18 = vpop.eup %1550  ;;  %1064 = vst [vmem:[%s2183_s15] sm:$0xff] %v1033_v16 }
 0x477   : > { %v1553_v19 = vpop.eup %1552  ;;  %v1035_v20 = vmul.f32 %v1551_v18, %v2136_v39  ;;  %v1023_v21 = vpop.xlane.xlu1 %1022 }
 0x478   : > { %v1045_v22 = vmul.f32 %v1553_v19, %v2139_v41  ;;  %1562 = vrcp.f32 %v1023_v21  ;;  %v1017_v23 = vpop.xlane.xlu0 %1016 }
 0x479   : > { %1065 = vst [vmem:[%s2183_s15 + $0x8] sm:$0xff] %v1035_v20  ;;  %1564 = vrcp.f32 %v1017_v23 }
 0x47a   : > { %v1555_v24 = vpop.eup %1554  ;;  %1070 = vst [vmem:[%s2183_s15 + $0x30] sm:$0xff] %v1045_v22 }
 0x47b   : > { %v1557_v25 = vpop.eup %1556  ;;  %v1047_v26 = vmul.f32 %v1555_v24, %v2144_v46  ;;  %v1019_v27 = vpop.xlane.xlu1 %1018 }
 0x47c   : > { %v1041_v28 = vmul.f32 %v1557_v25, %v2146_v48  ;;  %1566 = vrcp.f32 %v1019_v27  ;;  %v1025_v29 = vpop.xlane.xlu0 %1024 }
 0x47d   : > { %1071 = vst [vmem:[%s2183_s15 + $0x38] sm:$0xff] %v1047_v26  ;;  %1568 = vrcp.f32 %v1025_v29 }
 0x47e   : > { %v1559_v30 = vpop.eup %1558  ;;  %1068 = vst [vmem:[%s2183_s15 + $0x20] sm:$0xff] %v1041_v28 }
 0x47f   : > { %v1561_v31 = vpop.eup %1560  ;;  %v1043_v32 = vmul.f32 %v1559_v30, %v2152_v54  ;;  %v1027_v33 = vpop.xlane.xlu1 %1026 }
 0x480   : > { %v1053_v34 = vmul.f32 %v1561_v31, %v2154_v56  ;;  %1570 = vrcp.f32 %v1027_v33  ;;  %v1029_v35 = vpop.xlane.xlu0 %1028 }
 0x481   : > { %1069 = vst [vmem:[%s2183_s15 + $0x28] sm:$0xff] %v1043_v32  ;;  %1572 = vrcp.f32 %v1029_v35 }
 0x482   : > { %v1563_v36 = vpop.eup %1562  ;;  %1074 = vst [vmem:[%s2183_s15 + $0x50] sm:$0xff] %v1053_v34 }
 0x483   : > { %v1565_v37 = vpop.eup %1564  ;;  %v1055_v38 = vmul.f32 %v1563_v36, %v2159_v60  ;;  %v1031_v39 = vpop.xlane.xlu1 %1030 }
 0x484   : > { %v1049_v40 = vmul.f32 %v1565_v37, %v2161_v61  ;;  %1574 = vrcp.f32 %v1031_v39 }
 0x485   : > { %1075 = vst [vmem:[%s2183_s15 + $0x58] sm:$0xff] %v1055_v38 }
 0x486   : > { %v1567_v41 = vpop.eup %1566  ;;  %1072 = vst [vmem:[%s2183_s15 + $0x40] sm:$0xff] %v1049_v40 }
 0x487   : > { %v1569_v42 = vpop.eup %1568  ;;  %v1051_v43 = vmul.f32 %v1567_v41, %v2165_v62 }
 0x488   : > { %v1057_v44 = vmul.f32 %v1569_v42, %v2167_v63 }
 0x489   : > { %1073 = vst [vmem:[%s2183_s15 + $0x48] sm:$0xff] %v1051_v43 }
 0x48a   : > { %v1571_v45 = vpop.eup %1570  ;;  %1076 = vst [vmem:[%s2183_s15 + $0x60] sm:$0xff] %v1057_v44 }
 0x48b   : > { %v1573_v46 = vpop.eup %1572  ;;  %v1059_v47 = vmul.f32 %v1571_v45, %v2171_v0 }
 0x48c   : > { %v1061_v48 = vmul.f32 %v1573_v46, %v2173_v1 }
 0x48d   : > { %1077 = vst [vmem:[%s2183_s15 + $0x68] sm:$0xff] %v1059_v47 }
 0x48e   : > { %v1575_v49 = vpop.eup %1574  ;;  %1078 = vst [vmem:[%s2183_s15 + $0x70] sm:$0xff] %v1061_v48 }
 0x48f   : > { %v1063_v50 = vmul.f32 %v1575_v49, %v2177_v2 }
 0x491   : > { %1079 = vst [vmem:[%s2183_s15 + $0x78] sm:$0xff] %v1063_v50 }
 0x492   : > { %1703 = shalt.err (!%p1700_p4)
}
 0x493   : > { %s1704_s23 = scalar_lea.hbm %s2219_s16, 2048  ;;  %s1708_s14 = scalar_lea.hbm %s2274_s7, 4096 }
 0x494   : > { %p1705_p9 = scmp.ne.s32.totalorder %s2219_s16, %s1704_s23  ;;  %p1709_p8 = scmp.lt.u32.totalorder %s2219_s16, %s2274_s7 }
 0x495   : > { %p1710_p13 = scmp.lt.u32.totalorder %s1708_s14, %s1704_s23  ;;  %p1712_p10 = scmp.lt.u32.totalorder %s1704_s23, %s2219_s16 }
 0x496   : > { %p1706_p0 = pnand %p1705_p9, %p1971_p5 }
 0x497   : > { %p1711_p6 = por %p1710_p13, %p1709_p8 }
 0x498   : > { %p1707_p11 = pneg %p1706_p0 }
 0x499   : > { %p1713_p3 = por %p1712_p10, %p1711_p6 }
 0x49b   : > { %p1714_p7 = pnand %p1713_p3, %p1707_p11 }
 0x49d   : > { %1717 = shalt.err (!%p1714_p7)
}
 0x49e   : > { %s1775_s8 = smov 128   ;;  %s1776_s17 = smov 8  }
 0x49f   : > { %1419 = dma.vmem_to_hbm [thread:$0]  (%p1971_p5), %s2221_s12, 2048, %s2219_s16, %s1081_s28, %s1775_s8, %s1775_s8, %s1776_s17  }
 0x4a0 PF: > { %s2294_s13 = sld [smem:[#allocation15_spill]]  ;;  %s1109_s20 = sand.u32 1, %s1752_s24  }
 0x4a1   : > { %p2296_p1 = scmp.ge.s32.totalorder %s1764_s27, 2  ;;  %s1110_s30 = scalar_lea.sflag [#allocation4], %s1109_s20 }
 0x4a6   : > { %p2295_p12 = scmp.ne.s32.totalorder %s2294_s13, 0 }
 0x4a8   : > { %p1436_p2 = pnand %p2296_p1, %p2295_p12 }
 0x4aa   : > { %1747 = dma.done.wait (!%p1436_p2), %s1110_s30, 2048  }
 0x4ab   : > { %1749 = vsyncadd (!%p1436_p2), %s1110_s30, 4294965248  ;;  %p22_p4 = scmp.ge.s32.totalorder %s1957_s22, 4   ;;  %s2297_s24 = smov %s1756_s25 }
 0x4ac   : > { %s2298_s25 = smov %s1760_s26  ;;  %s2299_s26 = smov %s1967_s18 }
 0x4ad   : > { %s2300_s27 = smov %s1957_s22  ;;  %24 = sbr.rel (!%p22_p4) target bundleno = 7 (0x7), region = 105 }
 0x4b4   :  { %1115 = vsyncpa [#allocation3], 1 }
 0x4b5   :  { %1117 = vsyncpa [#allocation3 + $0x1], 1 }
 0x4b6   :  { %1118 = vsyncpa [#allocation6], 1 }
 0x4b7   :  { %1119 = vsyncpa [#allocation9], 1 }
 0x4b8   :  { %1120 = vsyncpa [#allocation4], 1 }
 0x4b9   :  { %1122 = vsyncpa [#allocation4 + $0x1], 1 }

</bundles_post_ra>
